<compile_context>
chip_gen: v7x
topology: tpu7x:2x2x1
jax: 0.10.0
libtpu: 0.0.40
codegen_flags: <defaults>
</compile_context>

<pallas_src>
import functools
import math

import jax
import jax.numpy as jnp
from jax.experimental import pallas as pl
from jax.experimental.pallas import tpu as pltpu


def _round_up(x: int, m: int) -> int:
    return ((x + m - 1) // m) * m


def _gather_kernel(ids_ref, tbl_hbm, o_ref, staging, sems, *, scale, tm, chunk):
    """One grid step gathers `tm` embedding rows for tokens [blk*tm, (blk+1)*tm)."""
    blk = pl.program_id(0)
    base = blk * tm
    n_chunks = tm // chunk

    def issue_chunk(c, slot):
        # `c` / `slot` may be traced ints; `r` is a static python index (unrolled).
        row0 = pl.multiple_of(c * chunk, chunk)
        for r in range(chunk):
            row = row0 + r
            tok = ids_ref[base + row]            # dynamic SMEM scalar read
            pltpu.make_async_copy(
                tbl_hbm.at[pl.ds(tok, 1), :],    # (1, D) row of the HBM table
                staging.at[pl.ds(row, 1), :],    # its slot in the VMEM staging buf
                sems.at[slot, r],
            ).start()

    def wait_chunk(c, slot):
        row0 = pl.multiple_of(c * chunk, chunk)
        for r in range(chunk):
            row = row0 + r
            pltpu.make_async_copy(
                tbl_hbm.at[pl.ds(0, 1), :],      # shape-only; wait is on the semaphore
                staging.at[pl.ds(row, 1), :],
                sems.at[slot, r],
            ).wait()

    # Prime with chunk 0; then each step issues chunk c+1 before waiting chunk c,
    # keeping up to 2*chunk row DMAs in flight.
    issue_chunk(0, 0)

    @pl.loop(0, n_chunks)
    def _(c):
        slot = c % 2

        @pl.when(c + 1 < n_chunks)
        def _():
            issue_chunk(c + 1, (c + 1) % 2)

        wait_chunk(c, slot)

    # sqrt(d_model) scale applied exactly once, at the final store.
    rows = staging[...]
    if rows.dtype != jnp.float32:
        rows = rows.astype(jnp.float32)
    o_ref[...] = (rows * scale).astype(o_ref.dtype)


def embeddings_forward(x_ids, table, *, tm=128, chunk=8, split_for_megacore=True):
    """x_ids: (B, S) int token ids; table: (V, D) embedding table.

    Returns (B, S, D) = table[x_ids] * sqrt(D) in the table's dtype.
    """
    B, S = x_ids.shape
    V, D = table.shape
    scale = float(D) ** 0.5

    M = B * S
    align = (8 * chunk) // math.gcd(8, chunk)          # lcm(8, chunk): sublane + chunk alignment
    tm = max(align, min(tm, _round_up(M, align)))
    tm = _round_up(tm, align)
    # v7x has 2 TensorCores: make sure the ("parallel",) row axis has >= 2 blocks
    # for short sequences so the megacore split has something to shard.
    if split_for_megacore and _round_up(M, tm) // tm < 2 and M > align:
        tm = _round_up(max(align, -(-M // 2)), align)

    M_pad = _round_up(M, tm)
    ids = x_ids.reshape(M).astype(jnp.int32)
    if M_pad != M:
        ids = jnp.pad(ids, (0, M_pad - M))             # padded rows gather row 0; sliced off

    n_blocks = M_pad // tm
    out_dtype = table.dtype

    # VMEM budget: staging buffer + double-buffered output tile + slack.
    vmem_needed = (tm * D * jnp.dtype(table.dtype).itemsize
                   + 2 * tm * D * jnp.dtype(out_dtype).itemsize
                   + (2 << 20))
    vmem_limit = int(min(max(32 << 20, vmem_needed), 100 << 20))

    kernel = functools.partial(_gather_kernel, scale=scale, tm=tm, chunk=chunk)

    out = pl.pallas_call(
        kernel,
        out_shape=jax.ShapeDtypeStruct((M_pad, D), out_dtype),
        grid_spec=pltpu.PrefetchScalarGridSpec(
            num_scalar_prefetch=1,                          # ids -> SMEM
            grid=(n_blocks,),
            in_specs=[pl.BlockSpec(memory_space=pl.ANY)],   # table stays in HBM
            out_specs=pl.BlockSpec((tm, D), lambda i, ids: (i, 0)),
            scratch_shapes=[
                pltpu.VMEM((tm, D), table.dtype),           # staging for gathered rows
                pltpu.SemaphoreType.DMA((2, chunk)),        # two chunks of DMAs in flight
            ],
        ),
        compiler_params=pltpu.CompilerParams(
            dimension_semantics=("parallel",),
            vmem_limit_bytes=vmem_limit,
        ),
    )(ids, table)

    return out[:M].reshape(B, S, D)


def reference_forward(x_ids, table):
    D = table.shape[1]
    return table[x_ids] * (float(D) ** 0.5)


if __name__ == "__main__":
    # Small shapes consistent with the module: batch=2, seq=8, d_model=32, vocab=128.
    B, S, D, V = 2, 8, 32, 128

    key = jax.random.PRNGKey(0)
    kx, kw = jax.random.split(key)

    x_ids = jax.random.randint(kx, (B, S), 0, V, dtype=jnp.int32)
    table = jax.random.normal(kw, (V, D), dtype=jnp.float32)

    ref = reference_forward(x_ids, table)

    # 1) Default config (tm clamped to the small problem -> 2 row blocks for megacore).
    out = jax.block_until_ready(embeddings_forward(x_ids, table))
    assert out.shape == (B, S, D)
    assert jnp.allclose(out, ref, atol=1e-5, rtol=1e-5), "mismatch vs reference"

    # 2) Multi-chunk path inside one row block (2 chunks -> double-buffered DMA pipeline).
    out2 = jax.block_until_ready(
        embeddings_forward(x_ids, table, tm=16, chunk=8, split_for_megacore=False))
    assert jnp.allclose(out2, ref, atol=1e-5, rtol=1e-5), "mismatch (multi-chunk)"

    # 3) Ragged M (10 tokens): padded id rows are gathered then sliced off.
    x_ragged = x_ids[:, :5]
    out3 = jax.block_until_ready(embeddings_forward(x_ragged, table, tm=8))
    assert jnp.allclose(out3, reference_forward(x_ragged, table),
                        atol=1e-5, rtol=1e-5), "mismatch (ragged M)"

    print("KERNEL_OK")
</pallas_src>

<mosaic_0001>
module attributes {stable_mosaic.version = 11 : i64} {
  func.func @_gather_kernel(%arg0: i32, %arg1: memref<16xi32, #tpu.memory_space<smem>>, %arg2: memref<128x32xf32, #tpu.memory_space<any>>, %arg3: memref<8x32xf32, #tpu.memory_space<vmem>>, %arg4: memref<8x32xf32, #tpu.memory_space<vmem>>, %arg5: memref<2x8x!tpu.dma_semaphore, #tpu.memory_space<semaphore_mem>>) attributes {dimension_semantics = [#tpu.dimension_semantics<parallel>], iteration_bounds = array<i64: 2>, scalar_prefetch = 1 : i64, scratch_operands = 2 : i64, tpu.core_type = #tpu.core_type<tc>, window_params = [{}, {transform_indices = @transform_1, window_bounds = array<i64: 8, 32>}]} {
    %c8_i32 = arith.constant 8 : i32
    %0 = arith.muli %arg0, %c8_i32 : i32
    %c0_i32 = arith.constant 0 : i32
    %1 = tpu.assume_multiple %c0_i32, 8 : i32
    %c0_i32_0 = arith.constant 0 : i32
    %2 = arith.addi %1, %c0_i32_0 : i32
    %3 = arith.addi %0, %2 : i32
    %4 = arith.index_cast %3 : i32 to index
    %5 = memref.load %arg1[%4] : memref<16xi32, #tpu.memory_space<smem>>
    %c0_i32_1 = arith.constant 0 : i32
    %c0_i32_2 = arith.constant 0 : i32
    %c0_i32_3 = arith.constant 0 : i32
    %6 = tpu.memref_slice %arg2[%5, %c0_i32_3] : memref<128x32xf32, #tpu.memory_space<any>> -> memref<1x32xf32, #tpu.memory_space<any>>
    %c0_i32_4 = arith.constant 0 : i32
    %7 = tpu.memref_slice %arg4[%2, %c0_i32_4] : memref<8x32xf32, #tpu.memory_space<vmem>> -> memref<1x32xf32, #tpu.memory_space<vmem>>
    %8 = tpu.memref_slice %arg5[%c0_i32_1, %c0_i32_2] : memref<2x8x!tpu.dma_semaphore, #tpu.memory_space<semaphore_mem>> -> memref<1x1x!tpu.dma_semaphore, #tpu.memory_space<semaphore_mem>>
    %9 = tpu.memref_squeeze %8 : memref<1x1x!tpu.dma_semaphore, #tpu.memory_space<semaphore_mem>> -> memref<!tpu.dma_semaphore, #tpu.memory_space<semaphore_mem>>
    tpu.enqueue_dma source(%6 : memref<1x32xf32, #tpu.memory_space<any>>) target(%7 : memref<1x32xf32, #tpu.memory_space<vmem>>) target_semaphore(%9 : memref<!tpu.dma_semaphore, #tpu.memory_space<semaphore_mem>>)
    %c1_i32 = arith.constant 1 : i32
    %10 = arith.addi %1, %c1_i32 : i32
    %11 = arith.addi %0, %10 : i32
    %12 = arith.index_cast %11 : i32 to index
    %13 = memref.load %arg1[%12] : memref<16xi32, #tpu.memory_space<smem>>
    %c0_i32_5 = arith.constant 0 : i32
    %c1_i32_6 = arith.constant 1 : i32
    %c0_i32_7 = arith.constant 0 : i32
    %14 = tpu.memref_slice %arg2[%13, %c0_i32_7] : memref<128x32xf32, #tpu.memory_space<any>> -> memref<1x32xf32, #tpu.memory_space<any>>
    %c0_i32_8 = arith.constant 0 : i32
    %15 = tpu.memref_slice %arg4[%10, %c0_i32_8] : memref<8x32xf32, #tpu.memory_space<vmem>> -> memref<1x32xf32, #tpu.memory_space<vmem>>
    %16 = tpu.memref_slice %arg5[%c0_i32_5, %c1_i32_6] : memref<2x8x!tpu.dma_semaphore, #tpu.memory_space<semaphore_mem>> -> memref<1x1x!tpu.dma_semaphore, #tpu.memory_space<semaphore_mem>>
    %17 = tpu.memref_squeeze %16 : memref<1x1x!tpu.dma_semaphore, #tpu.memory_space<semaphore_mem>> -> memref<!tpu.dma_semaphore, #tpu.memory_space<semaphore_mem>>
    tpu.enqueue_dma source(%14 : memref<1x32xf32, #tpu.memory_space<any>>) target(%15 : memref<1x32xf32, #tpu.memory_space<vmem>>) target_semaphore(%17 : memref<!tpu.dma_semaphore, #tpu.memory_space<semaphore_mem>>)
    %c2_i32 = arith.constant 2 : i32
    %18 = arith.addi %1, %c2_i32 : i32
    %19 = arith.addi %0, %18 : i32
    %20 = arith.index_cast %19 : i32 to index
    %21 = memref.load %arg1[%20] : memref<16xi32, #tpu.memory_space<smem>>
    %c0_i32_9 = arith.constant 0 : i32
    %c2_i32_10 = arith.constant 2 : i32
    %c0_i32_11 = arith.constant 0 : i32
    %22 = tpu.memref_slice %arg2[%21, %c0_i32_11] : memref<128x32xf32, #tpu.memory_space<any>> -> memref<1x32xf32, #tpu.memory_space<any>>
    %c0_i32_12 = arith.constant 0 : i32
    %23 = tpu.memref_slice %arg4[%18, %c0_i32_12] : memref<8x32xf32, #tpu.memory_space<vmem>> -> memref<1x32xf32, #tpu.memory_space<vmem>>
    %24 = tpu.memref_slice %arg5[%c0_i32_9, %c2_i32_10] : memref<2x8x!tpu.dma_semaphore, #tpu.memory_space<semaphore_mem>> -> memref<1x1x!tpu.dma_semaphore, #tpu.memory_space<semaphore_mem>>
    %25 = tpu.memref_squeeze %24 : memref<1x1x!tpu.dma_semaphore, #tpu.memory_space<semaphore_mem>> -> memref<!tpu.dma_semaphore, #tpu.memory_space<semaphore_mem>>
    tpu.enqueue_dma source(%22 : memref<1x32xf32, #tpu.memory_space<any>>) target(%23 : memref<1x32xf32, #tpu.memory_space<vmem>>) target_semaphore(%25 : memref<!tpu.dma_semaphore, #tpu.memory_space<semaphore_mem>>)
    %c3_i32 = arith.constant 3 : i32
    %26 = arith.addi %1, %c3_i32 : i32
    %27 = arith.addi %0, %26 : i32
    %28 = arith.index_cast %27 : i32 to index
    %29 = memref.load %arg1[%28] : memref<16xi32, #tpu.memory_space<smem>>
    %c0_i32_13 = arith.constant 0 : i32
    %c3_i32_14 = arith.constant 3 : i32
    %c0_i32_15 = arith.constant 0 : i32
    %30 = tpu.memref_slice %arg2[%29, %c0_i32_15] : memref<128x32xf32, #tpu.memory_space<any>> -> memref<1x32xf32, #tpu.memory_space<any>>
    %c0_i32_16 = arith.constant 0 : i32
    %31 = tpu.memref_slice %arg4[%26, %c0_i32_16] : memref<8x32xf32, #tpu.memory_space<vmem>> -> memref<1x32xf32, #tpu.memory_space<vmem>>
    %32 = tpu.memref_slice %arg5[%c0_i32_13, %c3_i32_14] : memref<2x8x!tpu.dma_semaphore, #tpu.memory_space<semaphore_mem>> -> memref<1x1x!tpu.dma_semaphore, #tpu.memory_space<semaphore_mem>>
    %33 = tpu.memref_squeeze %32 : memref<1x1x!tpu.dma_semaphore, #tpu.memory_space<semaphore_mem>> -> memref<!tpu.dma_semaphore, #tpu.memory_space<semaphore_mem>>
    tpu.enqueue_dma source(%30 : memref<1x32xf32, #tpu.memory_space<any>>) target(%31 : memref<1x32xf32, #tpu.memory_space<vmem>>) target_semaphore(%33 : memref<!tpu.dma_semaphore, #tpu.memory_space<semaphore_mem>>)
    %c4_i32 = arith.constant 4 : i32
    %34 = arith.addi %1, %c4_i32 : i32
    %35 = arith.addi %0, %34 : i32
    %36 = arith.index_cast %35 : i32 to index
    %37 = memref.load %arg1[%36] : memref<16xi32, #tpu.memory_space<smem>>
    %c0_i32_17 = arith.constant 0 : i32
    %c4_i32_18 = arith.constant 4 : i32
    %c0_i32_19 = arith.constant 0 : i32
    %38 = tpu.memref_slice %arg2[%37, %c0_i32_19] : memref<128x32xf32, #tpu.memory_space<any>> -> memref<1x32xf32, #tpu.memory_space<any>>
    %c0_i32_20 = arith.constant 0 : i32
    %39 = tpu.memref_slice %arg4[%34, %c0_i32_20] : memref<8x32xf32, #tpu.memory_space<vmem>> -> memref<1x32xf32, #tpu.memory_space<vmem>>
    %40 = tpu.memref_slice %arg5[%c0_i32_17, %c4_i32_18] : memref<2x8x!tpu.dma_semaphore, #tpu.memory_space<semaphore_mem>> -> memref<1x1x!tpu.dma_semaphore, #tpu.memory_space<semaphore_mem>>
    %41 = tpu.memref_squeeze %40 : memref<1x1x!tpu.dma_semaphore, #tpu.memory_space<semaphore_mem>> -> memref<!tpu.dma_semaphore, #tpu.memory_space<semaphore_mem>>
    tpu.enqueue_dma source(%38 : memref<1x32xf32, #tpu.memory_space<any>>) target(%39 : memref<1x32xf32, #tpu.memory_space<vmem>>) target_semaphore(%41 : memref<!tpu.dma_semaphore, #tpu.memory_space<semaphore_mem>>)
    %c5_i32 = arith.constant 5 : i32
    %42 = arith.addi %1, %c5_i32 : i32
    %43 = arith.addi %0, %42 : i32
    %44 = arith.index_cast %43 : i32 to index
    %45 = memref.load %arg1[%44] : memref<16xi32, #tpu.memory_space<smem>>
    %c0_i32_21 = arith.constant 0 : i32
    %c5_i32_22 = arith.constant 5 : i32
    %c0_i32_23 = arith.constant 0 : i32
    %46 = tpu.memref_slice %arg2[%45, %c0_i32_23] : memref<128x32xf32, #tpu.memory_space<any>> -> memref<1x32xf32, #tpu.memory_space<any>>
    %c0_i32_24 = arith.constant 0 : i32
    %47 = tpu.memref_slice %arg4[%42, %c0_i32_24] : memref<8x32xf32, #tpu.memory_space<vmem>> -> memref<1x32xf32, #tpu.memory_space<vmem>>
    %48 = tpu.memref_slice %arg5[%c0_i32_21, %c5_i32_22] : memref<2x8x!tpu.dma_semaphore, #tpu.memory_space<semaphore_mem>> -> memref<1x1x!tpu.dma_semaphore, #tpu.memory_space<semaphore_mem>>
    %49 = tpu.memref_squeeze %48 : memref<1x1x!tpu.dma_semaphore, #tpu.memory_space<semaphore_mem>> -> memref<!tpu.dma_semaphore, #tpu.memory_space<semaphore_mem>>
    tpu.enqueue_dma source(%46 : memref<1x32xf32, #tpu.memory_space<any>>) target(%47 : memref<1x32xf32, #tpu.memory_space<vmem>>) target_semaphore(%49 : memref<!tpu.dma_semaphore, #tpu.memory_space<semaphore_mem>>)
    %c6_i32 = arith.constant 6 : i32
    %50 = arith.addi %1, %c6_i32 : i32
    %51 = arith.addi %0, %50 : i32
    %52 = arith.index_cast %51 : i32 to index
    %53 = memref.load %arg1[%52] : memref<16xi32, #tpu.memory_space<smem>>
    %c0_i32_25 = arith.constant 0 : i32
    %c6_i32_26 = arith.constant 6 : i32
    %c0_i32_27 = arith.constant 0 : i32
    %54 = tpu.memref_slice %arg2[%53, %c0_i32_27] : memref<128x32xf32, #tpu.memory_space<any>> -> memref<1x32xf32, #tpu.memory_space<any>>
    %c0_i32_28 = arith.constant 0 : i32
    %55 = tpu.memref_slice %arg4[%50, %c0_i32_28] : memref<8x32xf32, #tpu.memory_space<vmem>> -> memref<1x32xf32, #tpu.memory_space<vmem>>
    %56 = tpu.memref_slice %arg5[%c0_i32_25, %c6_i32_26] : memref<2x8x!tpu.dma_semaphore, #tpu.memory_space<semaphore_mem>> -> memref<1x1x!tpu.dma_semaphore, #tpu.memory_space<semaphore_mem>>
    %57 = tpu.memref_squeeze %56 : memref<1x1x!tpu.dma_semaphore, #tpu.memory_space<semaphore_mem>> -> memref<!tpu.dma_semaphore, #tpu.memory_space<semaphore_mem>>
    tpu.enqueue_dma source(%54 : memref<1x32xf32, #tpu.memory_space<any>>) target(%55 : memref<1x32xf32, #tpu.memory_space<vmem>>) target_semaphore(%57 : memref<!tpu.dma_semaphore, #tpu.memory_space<semaphore_mem>>)
    %c7_i32 = arith.constant 7 : i32
    %58 = arith.addi %1, %c7_i32 : i32
    %59 = arith.addi %0, %58 : i32
    %60 = arith.index_cast %59 : i32 to index
    %61 = memref.load %arg1[%60] : memref<16xi32, #tpu.memory_space<smem>>
    %c0_i32_29 = arith.constant 0 : i32
    %c7_i32_30 = arith.constant 7 : i32
    %c0_i32_31 = arith.constant 0 : i32
    %62 = tpu.memref_slice %arg2[%61, %c0_i32_31] : memref<128x32xf32, #tpu.memory_space<any>> -> memref<1x32xf32, #tpu.memory_space<any>>
    %c0_i32_32 = arith.constant 0 : i32
    %63 = tpu.memref_slice %arg4[%58, %c0_i32_32] : memref<8x32xf32, #tpu.memory_space<vmem>> -> memref<1x32xf32, #tpu.memory_space<vmem>>
    %64 = tpu.memref_slice %arg5[%c0_i32_29, %c7_i32_30] : memref<2x8x!tpu.dma_semaphore, #tpu.memory_space<semaphore_mem>> -> memref<1x1x!tpu.dma_semaphore, #tpu.memory_space<semaphore_mem>>
    %65 = tpu.memref_squeeze %64 : memref<1x1x!tpu.dma_semaphore, #tpu.memory_space<semaphore_mem>> -> memref<!tpu.dma_semaphore, #tpu.memory_space<semaphore_mem>>
    tpu.enqueue_dma source(%62 : memref<1x32xf32, #tpu.memory_space<any>>) target(%63 : memref<1x32xf32, #tpu.memory_space<vmem>>) target_semaphore(%65 : memref<!tpu.dma_semaphore, #tpu.memory_space<semaphore_mem>>)
    %c0_i32_33 = arith.constant 0 : i32
    %c1_i32_34 = arith.constant 1 : i32
    %66 = arith.muli %c0_i32_33, %c1_i32_34 : i32
    %c0_i32_35 = arith.constant 0 : i32
    %67 = arith.addi %c0_i32_35, %66 : i32
    %c2_i32_36 = arith.constant 2 : i32
    %c0_i32_37 = arith.constant 0 : i32
    %68 = arith.cmpi eq, %c2_i32_36, %c0_i32_37 : i32
    %c1_i32_38 = arith.constant 1 : i32
    %69 = arith.select %68, %c1_i32_38, %c2_i32_36 : i32
    %70 = arith.remsi %67, %69 : i32
    %c0_i32_39 = arith.constant 0 : i32
    %71 = arith.cmpi ne, %70, %c0_i32_39 : i32
    %c0_i32_40 = arith.constant 0 : i32
    %72 = arith.cmpi slt, %70, %c0_i32_40 : i32
    %c0_i32_41 = arith.constant 0 : i32
    %73 = arith.cmpi slt, %69, %c0_i32_41 : i32
    %74 = arith.xori %72, %73 : i1
    %75 = arith.andi %74, %71 : i1
    %76 = arith.addi %70, %69 : i32
    %77 = arith.select %75, %76, %70 : i32
    %c1_i32_42 = arith.constant 1 : i32
    %78 = arith.addi %67, %c1_i32_42 : i32
    %c1_i32_43 = arith.constant 1 : i32
    %79 = arith.cmpi slt, %78, %c1_i32_43 : i32
    %80 = arith.extui %79 : i1 to i32
    %c0_i32_44 = arith.constant 0 : i32
    %81 = arith.cmpi ne, %80, %c0_i32_44 : i32
    scf.if %81 {
      %c1_i32_90 = arith.constant 1 : i32
      %128 = arith.addi %67, %c1_i32_90 : i32
      %c1_i32_91 = arith.constant 1 : i32
      %129 = arith.addi %67, %c1_i32_91 : i32
      %c2_i32_92 = arith.constant 2 : i32
      %c0_i32_93 = arith.constant 0 : i32
      %130 = arith.cmpi eq, %c2_i32_92, %c0_i32_93 : i32
      %c1_i32_94 = arith.constant 1 : i32
      %131 = arith.select %130, %c1_i32_94, %c2_i32_92 : i32
      %132 = arith.remsi %129, %131 : i32
      %c0_i32_95 = arith.constant 0 : i32
      %133 = arith.cmpi ne, %132, %c0_i32_95 : i32
      %c0_i32_96 = arith.constant 0 : i32
      %134 = arith.cmpi slt, %132, %c0_i32_96 : i32
      %c0_i32_97 = arith.constant 0 : i32
      %135 = arith.cmpi slt, %131, %c0_i32_97 : i32
      %136 = arith.xori %134, %135 : i1
      %137 = arith.andi %136, %133 : i1
      %138 = arith.addi %132, %131 : i32
      %139 = arith.select %137, %138, %132 : i32
      %c8_i32_98 = arith.constant 8 : i32
      %140 = arith.muli %128, %c8_i32_98 : i32
      %141 = tpu.assume_multiple %140, 8 : i32
      %c0_i32_99 = arith.constant 0 : i32
      %142 = arith.addi %141, %c0_i32_99 : i32
      %143 = arith.addi %0, %142 : i32
      %144 = arith.index_cast %143 : i32 to index
      %145 = memref.load %arg1[%144] : memref<16xi32, #tpu.memory_space<smem>>
      %c0_i32_100 = arith.constant 0 : i32
      %c0_i32_101 = arith.constant 0 : i32
      %146 = tpu.memref_slice %arg2[%145, %c0_i32_101] : memref<128x32xf32, #tpu.memory_space<any>> -> memref<1x32xf32, #tpu.memory_space<any>>
      %c0_i32_102 = arith.constant 0 : i32
      %147 = tpu.memref_slice %arg4[%142, %c0_i32_102] : memref<8x32xf32, #tpu.memory_space<vmem>> -> memref<1x32xf32, #tpu.memory_space<vmem>>
      %148 = tpu.memref_slice %arg5[%139, %c0_i32_100] : memref<2x8x!tpu.dma_semaphore, #tpu.memory_space<semaphore_mem>> -> memref<1x1x!tpu.dma_semaphore, #tpu.memory_space<semaphore_mem>>
      %149 = tpu.memref_squeeze %148 : memref<1x1x!tpu.dma_semaphore, #tpu.memory_space<semaphore_mem>> -> memref<!tpu.dma_semaphore, #tpu.memory_space<semaphore_mem>>
      tpu.enqueue_dma source(%146 : memref<1x32xf32, #tpu.memory_space<any>>) target(%147 : memref<1x32xf32, #tpu.memory_space<vmem>>) target_semaphore(%149 : memref<!tpu.dma_semaphore, #tpu.memory_space<semaphore_mem>>)
      %c1_i32_103 = arith.constant 1 : i32
      %150 = arith.addi %141, %c1_i32_103 : i32
      %151 = arith.addi %0, %150 : i32
      %152 = arith.index_cast %151 : i32 to index
      %153 = memref.load %arg1[%152] : memref<16xi32, #tpu.memory_space<smem>>
      %c1_i32_104 = arith.constant 1 : i32
      %c0_i32_105 = arith.constant 0 : i32
      %154 = tpu.memref_slice %arg2[%153, %c0_i32_105] : memref<128x32xf32, #tpu.memory_space<any>> -> memref<1x32xf32, #tpu.memory_space<any>>
      %c0_i32_106 = arith.constant 0 : i32
      %155 = tpu.memref_slice %arg4[%150, %c0_i32_106] : memref<8x32xf32, #tpu.memory_space<vmem>> -> memref<1x32xf32, #tpu.memory_space<vmem>>
      %156 = tpu.memref_slice %arg5[%139, %c1_i32_104] : memref<2x8x!tpu.dma_semaphore, #tpu.memory_space<semaphore_mem>> -> memref<1x1x!tpu.dma_semaphore, #tpu.memory_space<semaphore_mem>>
      %157 = tpu.memref_squeeze %156 : memref<1x1x!tpu.dma_semaphore, #tpu.memory_space<semaphore_mem>> -> memref<!tpu.dma_semaphore, #tpu.memory_space<semaphore_mem>>
      tpu.enqueue_dma source(%154 : memref<1x32xf32, #tpu.memory_space<any>>) target(%155 : memref<1x32xf32, #tpu.memory_space<vmem>>) target_semaphore(%157 : memref<!tpu.dma_semaphore, #tpu.memory_space<semaphore_mem>>)
      %c2_i32_107 = arith.constant 2 : i32
      %158 = arith.addi %141, %c2_i32_107 : i32
      %159 = arith.addi %0, %158 : i32
      %160 = arith.index_cast %159 : i32 to index
      %161 = memref.load %arg1[%160] : memref<16xi32, #tpu.memory_space<smem>>
      %c2_i32_108 = arith.constant 2 : i32
      %c0_i32_109 = arith.constant 0 : i32
      %162 = tpu.memref_slice %arg2[%161, %c0_i32_109] : memref<128x32xf32, #tpu.memory_space<any>> -> memref<1x32xf32, #tpu.memory_space<any>>
      %c0_i32_110 = arith.constant 0 : i32
      %163 = tpu.memref_slice %arg4[%158, %c0_i32_110] : memref<8x32xf32, #tpu.memory_space<vmem>> -> memref<1x32xf32, #tpu.memory_space<vmem>>
      %164 = tpu.memref_slice %arg5[%139, %c2_i32_108] : memref<2x8x!tpu.dma_semaphore, #tpu.memory_space<semaphore_mem>> -> memref<1x1x!tpu.dma_semaphore, #tpu.memory_space<semaphore_mem>>
      %165 = tpu.memref_squeeze %164 : memref<1x1x!tpu.dma_semaphore, #tpu.memory_space<semaphore_mem>> -> memref<!tpu.dma_semaphore, #tpu.memory_space<semaphore_mem>>
      tpu.enqueue_dma source(%162 : memref<1x32xf32, #tpu.memory_space<any>>) target(%163 : memref<1x32xf32, #tpu.memory_space<vmem>>) target_semaphore(%165 : memref<!tpu.dma_semaphore, #tpu.memory_space<semaphore_mem>>)
      %c3_i32_111 = arith.constant 3 : i32
      %166 = arith.addi %141, %c3_i32_111 : i32
      %167 = arith.addi %0, %166 : i32
      %168 = arith.index_cast %167 : i32 to index
      %169 = memref.load %arg1[%168] : memref<16xi32, #tpu.memory_space<smem>>
      %c3_i32_112 = arith.constant 3 : i32
      %c0_i32_113 = arith.constant 0 : i32
      %170 = tpu.memref_slice %arg2[%169, %c0_i32_113] : memref<128x32xf32, #tpu.memory_space<any>> -> memref<1x32xf32, #tpu.memory_space<any>>
      %c0_i32_114 = arith.constant 0 : i32
      %171 = tpu.memref_slice %arg4[%166, %c0_i32_114] : memref<8x32xf32, #tpu.memory_space<vmem>> -> memref<1x32xf32, #tpu.memory_space<vmem>>
      %172 = tpu.memref_slice %arg5[%139, %c3_i32_112] : memref<2x8x!tpu.dma_semaphore, #tpu.memory_space<semaphore_mem>> -> memref<1x1x!tpu.dma_semaphore, #tpu.memory_space<semaphore_mem>>
      %173 = tpu.memref_squeeze %172 : memref<1x1x!tpu.dma_semaphore, #tpu.memory_space<semaphore_mem>> -> memref<!tpu.dma_semaphore, #tpu.memory_space<semaphore_mem>>
      tpu.enqueue_dma source(%170 : memref<1x32xf32, #tpu.memory_space<any>>) target(%171 : memref<1x32xf32, #tpu.memory_space<vmem>>) target_semaphore(%173 : memref<!tpu.dma_semaphore, #tpu.memory_space<semaphore_mem>>)
      %c4_i32_115 = arith.constant 4 : i32
      %174 = arith.addi %141, %c4_i32_115 : i32
      %175 = arith.addi %0, %174 : i32
      %176 = arith.index_cast %175 : i32 to index
      %177 = memref.load %arg1[%176] : memref<16xi32, #tpu.memory_space<smem>>
      %c4_i32_116 = arith.constant 4 : i32
      %c0_i32_117 = arith.constant 0 : i32
      %178 = tpu.memref_slice %arg2[%177, %c0_i32_117] : memref<128x32xf32, #tpu.memory_space<any>> -> memref<1x32xf32, #tpu.memory_space<any>>
      %c0_i32_118 = arith.constant 0 : i32
      %179 = tpu.memref_slice %arg4[%174, %c0_i32_118] : memref<8x32xf32, #tpu.memory_space<vmem>> -> memref<1x32xf32, #tpu.memory_space<vmem>>
      %180 = tpu.memref_slice %arg5[%139, %c4_i32_116] : memref<2x8x!tpu.dma_semaphore, #tpu.memory_space<semaphore_mem>> -> memref<1x1x!tpu.dma_semaphore, #tpu.memory_space<semaphore_mem>>
      %181 = tpu.memref_squeeze %180 : memref<1x1x!tpu.dma_semaphore, #tpu.memory_space<semaphore_mem>> -> memref<!tpu.dma_semaphore, #tpu.memory_space<semaphore_mem>>
      tpu.enqueue_dma source(%178 : memref<1x32xf32, #tpu.memory_space<any>>) target(%179 : memref<1x32xf32, #tpu.memory_space<vmem>>) target_semaphore(%181 : memref<!tpu.dma_semaphore, #tpu.memory_space<semaphore_mem>>)
      %c5_i32_119 = arith.constant 5 : i32
      %182 = arith.addi %141, %c5_i32_119 : i32
      %183 = arith.addi %0, %182 : i32
      %184 = arith.index_cast %183 : i32 to index
      %185 = memref.load %arg1[%184] : memref<16xi32, #tpu.memory_space<smem>>
      %c5_i32_120 = arith.constant 5 : i32
      %c0_i32_121 = arith.constant 0 : i32
      %186 = tpu.memref_slice %arg2[%185, %c0_i32_121] : memref<128x32xf32, #tpu.memory_space<any>> -> memref<1x32xf32, #tpu.memory_space<any>>
      %c0_i32_122 = arith.constant 0 : i32
      %187 = tpu.memref_slice %arg4[%182, %c0_i32_122] : memref<8x32xf32, #tpu.memory_space<vmem>> -> memref<1x32xf32, #tpu.memory_space<vmem>>
      %188 = tpu.memref_slice %arg5[%139, %c5_i32_120] : memref<2x8x!tpu.dma_semaphore, #tpu.memory_space<semaphore_mem>> -> memref<1x1x!tpu.dma_semaphore, #tpu.memory_space<semaphore_mem>>
      %189 = tpu.memref_squeeze %188 : memref<1x1x!tpu.dma_semaphore, #tpu.memory_space<semaphore_mem>> -> memref<!tpu.dma_semaphore, #tpu.memory_space<semaphore_mem>>
      tpu.enqueue_dma source(%186 : memref<1x32xf32, #tpu.memory_space<any>>) target(%187 : memref<1x32xf32, #tpu.memory_space<vmem>>) target_semaphore(%189 : memref<!tpu.dma_semaphore, #tpu.memory_space<semaphore_mem>>)
      %c6_i32_123 = arith.constant 6 : i32
      %190 = arith.addi %141, %c6_i32_123 : i32
      %191 = arith.addi %0, %190 : i32
      %192 = arith.index_cast %191 : i32 to index
      %193 = memref.load %arg1[%192] : memref<16xi32, #tpu.memory_space<smem>>
      %c6_i32_124 = arith.constant 6 : i32
      %c0_i32_125 = arith.constant 0 : i32
      %194 = tpu.memref_slice %arg2[%193, %c0_i32_125] : memref<128x32xf32, #tpu.memory_space<any>> -> memref<1x32xf32, #tpu.memory_space<any>>
      %c0_i32_126 = arith.constant 0 : i32
      %195 = tpu.memref_slice %arg4[%190, %c0_i32_126] : memref<8x32xf32, #tpu.memory_space<vmem>> -> memref<1x32xf32, #tpu.memory_space<vmem>>
      %196 = tpu.memref_slice %arg5[%139, %c6_i32_124] : memref<2x8x!tpu.dma_semaphore, #tpu.memory_space<semaphore_mem>> -> memref<1x1x!tpu.dma_semaphore, #tpu.memory_space<semaphore_mem>>
      %197 = tpu.memref_squeeze %196 : memref<1x1x!tpu.dma_semaphore, #tpu.memory_space<semaphore_mem>> -> memref<!tpu.dma_semaphore, #tpu.memory_space<semaphore_mem>>
      tpu.enqueue_dma source(%194 : memref<1x32xf32, #tpu.memory_space<any>>) target(%195 : memref<1x32xf32, #tpu.memory_space<vmem>>) target_semaphore(%197 : memref<!tpu.dma_semaphore, #tpu.memory_space<semaphore_mem>>)
      %c7_i32_127 = arith.constant 7 : i32
      %198 = arith.addi %141, %c7_i32_127 : i32
      %199 = arith.addi %0, %198 : i32
      %200 = arith.index_cast %199 : i32 to index
      %201 = memref.load %arg1[%200] : memref<16xi32, #tpu.memory_space<smem>>
      %c7_i32_128 = arith.constant 7 : i32
      %c0_i32_129 = arith.constant 0 : i32
      %202 = tpu.memref_slice %arg2[%201, %c0_i32_129] : memref<128x32xf32, #tpu.memory_space<any>> -> memref<1x32xf32, #tpu.memory_space<any>>
      %c0_i32_130 = arith.constant 0 : i32
      %203 = tpu.memref_slice %arg4[%198, %c0_i32_130] : memref<8x32xf32, #tpu.memory_space<vmem>> -> memref<1x32xf32, #tpu.memory_space<vmem>>
      %204 = tpu.memref_slice %arg5[%139, %c7_i32_128] : memref<2x8x!tpu.dma_semaphore, #tpu.memory_space<semaphore_mem>> -> memref<1x1x!tpu.dma_semaphore, #tpu.memory_space<semaphore_mem>>
      %205 = tpu.memref_squeeze %204 : memref<1x1x!tpu.dma_semaphore, #tpu.memory_space<semaphore_mem>> -> memref<!tpu.dma_semaphore, #tpu.memory_space<semaphore_mem>>
      tpu.enqueue_dma source(%202 : memref<1x32xf32, #tpu.memory_space<any>>) target(%203 : memref<1x32xf32, #tpu.memory_space<vmem>>) target_semaphore(%205 : memref<!tpu.dma_semaphore, #tpu.memory_space<semaphore_mem>>)
    } else {
    }
    %c8_i32_45 = arith.constant 8 : i32
    %82 = arith.muli %67, %c8_i32_45 : i32
    %83 = tpu.assume_multiple %82, 8 : i32
    %c0_i32_46 = arith.constant 0 : i32
    %84 = arith.addi %83, %c0_i32_46 : i32
    %c0_i32_47 = arith.constant 0 : i32
    %c0_i32_48 = arith.constant 0 : i32
    %c0_i32_49 = arith.constant 0 : i32
    %85 = tpu.memref_slice %arg2[%c0_i32_48, %c0_i32_49] : memref<128x32xf32, #tpu.memory_space<any>> -> memref<1x32xf32, #tpu.memory_space<any>>
    %c0_i32_50 = arith.constant 0 : i32
    %86 = tpu.memref_slice %arg4[%84, %c0_i32_50] : memref<8x32xf32, #tpu.memory_space<vmem>> -> memref<1x32xf32, #tpu.memory_space<vmem>>
    %87 = tpu.memref_slice %arg5[%77, %c0_i32_47] : memref<2x8x!tpu.dma_semaphore, #tpu.memory_space<semaphore_mem>> -> memref<1x1x!tpu.dma_semaphore, #tpu.memory_space<semaphore_mem>>
    %88 = tpu.memref_squeeze %87 : memref<1x1x!tpu.dma_semaphore, #tpu.memory_space<semaphore_mem>> -> memref<!tpu.dma_semaphore, #tpu.memory_space<semaphore_mem>>
    tpu.wait_dma2 semaphore(%88 : memref<!tpu.dma_semaphore, #tpu.memory_space<semaphore_mem>>) src(%85 : memref<1x32xf32, #tpu.memory_space<any>>) dst(%86 : memref<1x32xf32, #tpu.memory_space<vmem>>)
    %c1_i32_51 = arith.constant 1 : i32
    %89 = arith.addi %83, %c1_i32_51 : i32
    %c1_i32_52 = arith.constant 1 : i32
    %c0_i32_53 = arith.constant 0 : i32
    %c0_i32_54 = arith.constant 0 : i32
    %90 = tpu.memref_slice %arg2[%c0_i32_53, %c0_i32_54] : memref<128x32xf32, #tpu.memory_space<any>> -> memref<1x32xf32, #tpu.memory_space<any>>
    %c0_i32_55 = arith.constant 0 : i32
    %91 = tpu.memref_slice %arg4[%89, %c0_i32_55] : memref<8x32xf32, #tpu.memory_space<vmem>> -> memref<1x32xf32, #tpu.memory_space<vmem>>
    %92 = tpu.memref_slice %arg5[%77, %c1_i32_52] : memref<2x8x!tpu.dma_semaphore, #tpu.memory_space<semaphore_mem>> -> memref<1x1x!tpu.dma_semaphore, #tpu.memory_space<semaphore_mem>>
    %93 = tpu.memref_squeeze %92 : memref<1x1x!tpu.dma_semaphore, #tpu.memory_space<semaphore_mem>> -> memref<!tpu.dma_semaphore, #tpu.memory_space<semaphore_mem>>
    tpu.wait_dma2 semaphore(%93 : memref<!tpu.dma_semaphore, #tpu.memory_space<semaphore_mem>>) src(%90 : memref<1x32xf32, #tpu.memory_space<any>>) dst(%91 : memref<1x32xf32, #tpu.memory_space<vmem>>)
    %c2_i32_56 = arith.constant 2 : i32
    %94 = arith.addi %83, %c2_i32_56 : i32
    %c2_i32_57 = arith.constant 2 : i32
    %c0_i32_58 = arith.constant 0 : i32
    %c0_i32_59 = arith.constant 0 : i32
    %95 = tpu.memref_slice %arg2[%c0_i32_58, %c0_i32_59] : memref<128x32xf32, #tpu.memory_space<any>> -> memref<1x32xf32, #tpu.memory_space<any>>
    %c0_i32_60 = arith.constant 0 : i32
    %96 = tpu.memref_slice %arg4[%94, %c0_i32_60] : memref<8x32xf32, #tpu.memory_space<vmem>> -> memref<1x32xf32, #tpu.memory_space<vmem>>
    %97 = tpu.memref_slice %arg5[%77, %c2_i32_57] : memref<2x8x!tpu.dma_semaphore, #tpu.memory_space<semaphore_mem>> -> memref<1x1x!tpu.dma_semaphore, #tpu.memory_space<semaphore_mem>>
    %98 = tpu.memref_squeeze %97 : memref<1x1x!tpu.dma_semaphore, #tpu.memory_space<semaphore_mem>> -> memref<!tpu.dma_semaphore, #tpu.memory_space<semaphore_mem>>
    tpu.wait_dma2 semaphore(%98 : memref<!tpu.dma_semaphore, #tpu.memory_space<semaphore_mem>>) src(%95 : memref<1x32xf32, #tpu.memory_space<any>>) dst(%96 : memref<1x32xf32, #tpu.memory_space<vmem>>)
    %c3_i32_61 = arith.constant 3 : i32
    %99 = arith.addi %83, %c3_i32_61 : i32
    %c3_i32_62 = arith.constant 3 : i32
    %c0_i32_63 = arith.constant 0 : i32
    %c0_i32_64 = arith.constant 0 : i32
    %100 = tpu.memref_slice %arg2[%c0_i32_63, %c0_i32_64] : memref<128x32xf32, #tpu.memory_space<any>> -> memref<1x32xf32, #tpu.memory_space<any>>
    %c0_i32_65 = arith.constant 0 : i32
    %101 = tpu.memref_slice %arg4[%99, %c0_i32_65] : memref<8x32xf32, #tpu.memory_space<vmem>> -> memref<1x32xf32, #tpu.memory_space<vmem>>
    %102 = tpu.memref_slice %arg5[%77, %c3_i32_62] : memref<2x8x!tpu.dma_semaphore, #tpu.memory_space<semaphore_mem>> -> memref<1x1x!tpu.dma_semaphore, #tpu.memory_space<semaphore_mem>>
    %103 = tpu.memref_squeeze %102 : memref<1x1x!tpu.dma_semaphore, #tpu.memory_space<semaphore_mem>> -> memref<!tpu.dma_semaphore, #tpu.memory_space<semaphore_mem>>
    tpu.wait_dma2 semaphore(%103 : memref<!tpu.dma_semaphore, #tpu.memory_space<semaphore_mem>>) src(%100 : memref<1x32xf32, #tpu.memory_space<any>>) dst(%101 : memref<1x32xf32, #tpu.memory_space<vmem>>)
    %c4_i32_66 = arith.constant 4 : i32
    %104 = arith.addi %83, %c4_i32_66 : i32
    %c4_i32_67 = arith.constant 4 : i32
    %c0_i32_68 = arith.constant 0 : i32
    %c0_i32_69 = arith.constant 0 : i32
    %105 = tpu.memref_slice %arg2[%c0_i32_68, %c0_i32_69] : memref<128x32xf32, #tpu.memory_space<any>> -> memref<1x32xf32, #tpu.memory_space<any>>
    %c0_i32_70 = arith.constant 0 : i32
    %106 = tpu.memref_slice %arg4[%104, %c0_i32_70] : memref<8x32xf32, #tpu.memory_space<vmem>> -> memref<1x32xf32, #tpu.memory_space<vmem>>
    %107 = tpu.memref_slice %arg5[%77, %c4_i32_67] : memref<2x8x!tpu.dma_semaphore, #tpu.memory_space<semaphore_mem>> -> memref<1x1x!tpu.dma_semaphore, #tpu.memory_space<semaphore_mem>>
    %108 = tpu.memref_squeeze %107 : memref<1x1x!tpu.dma_semaphore, #tpu.memory_space<semaphore_mem>> -> memref<!tpu.dma_semaphore, #tpu.memory_space<semaphore_mem>>
    tpu.wait_dma2 semaphore(%108 : memref<!tpu.dma_semaphore, #tpu.memory_space<semaphore_mem>>) src(%105 : memref<1x32xf32, #tpu.memory_space<any>>) dst(%106 : memref<1x32xf32, #tpu.memory_space<vmem>>)
    %c5_i32_71 = arith.constant 5 : i32
    %109 = arith.addi %83, %c5_i32_71 : i32
    %c5_i32_72 = arith.constant 5 : i32
    %c0_i32_73 = arith.constant 0 : i32
    %c0_i32_74 = arith.constant 0 : i32
    %110 = tpu.memref_slice %arg2[%c0_i32_73, %c0_i32_74] : memref<128x32xf32, #tpu.memory_space<any>> -> memref<1x32xf32, #tpu.memory_space<any>>
    %c0_i32_75 = arith.constant 0 : i32
    %111 = tpu.memref_slice %arg4[%109, %c0_i32_75] : memref<8x32xf32, #tpu.memory_space<vmem>> -> memref<1x32xf32, #tpu.memory_space<vmem>>
    %112 = tpu.memref_slice %arg5[%77, %c5_i32_72] : memref<2x8x!tpu.dma_semaphore, #tpu.memory_space<semaphore_mem>> -> memref<1x1x!tpu.dma_semaphore, #tpu.memory_space<semaphore_mem>>
    %113 = tpu.memref_squeeze %112 : memref<1x1x!tpu.dma_semaphore, #tpu.memory_space<semaphore_mem>> -> memref<!tpu.dma_semaphore, #tpu.memory_space<semaphore_mem>>
    tpu.wait_dma2 semaphore(%113 : memref<!tpu.dma_semaphore, #tpu.memory_space<semaphore_mem>>) src(%110 : memref<1x32xf32, #tpu.memory_space<any>>) dst(%111 : memref<1x32xf32, #tpu.memory_space<vmem>>)
    %c6_i32_76 = arith.constant 6 : i32
    %114 = arith.addi %83, %c6_i32_76 : i32
    %c6_i32_77 = arith.constant 6 : i32
    %c0_i32_78 = arith.constant 0 : i32
    %c0_i32_79 = arith.constant 0 : i32
    %115 = tpu.memref_slice %arg2[%c0_i32_78, %c0_i32_79] : memref<128x32xf32, #tpu.memory_space<any>> -> memref<1x32xf32, #tpu.memory_space<any>>
    %c0_i32_80 = arith.constant 0 : i32
    %116 = tpu.memref_slice %arg4[%114, %c0_i32_80] : memref<8x32xf32, #tpu.memory_space<vmem>> -> memref<1x32xf32, #tpu.memory_space<vmem>>
    %117 = tpu.memref_slice %arg5[%77, %c6_i32_77] : memref<2x8x!tpu.dma_semaphore, #tpu.memory_space<semaphore_mem>> -> memref<1x1x!tpu.dma_semaphore, #tpu.memory_space<semaphore_mem>>
    %118 = tpu.memref_squeeze %117 : memref<1x1x!tpu.dma_semaphore, #tpu.memory_space<semaphore_mem>> -> memref<!tpu.dma_semaphore, #tpu.memory_space<semaphore_mem>>
    tpu.wait_dma2 semaphore(%118 : memref<!tpu.dma_semaphore, #tpu.memory_space<semaphore_mem>>) src(%115 : memref<1x32xf32, #tpu.memory_space<any>>) dst(%116 : memref<1x32xf32, #tpu.memory_space<vmem>>)
    %c7_i32_81 = arith.constant 7 : i32
    %119 = arith.addi %83, %c7_i32_81 : i32
    %c7_i32_82 = arith.constant 7 : i32
    %c0_i32_83 = arith.constant 0 : i32
    %c0_i32_84 = arith.constant 0 : i32
    %120 = tpu.memref_slice %arg2[%c0_i32_83, %c0_i32_84] : memref<128x32xf32, #tpu.memory_space<any>> -> memref<1x32xf32, #tpu.memory_space<any>>
    %c0_i32_85 = arith.constant 0 : i32
    %121 = tpu.memref_slice %arg4[%119, %c0_i32_85] : memref<8x32xf32, #tpu.memory_space<vmem>> -> memref<1x32xf32, #tpu.memory_space<vmem>>
    %122 = tpu.memref_slice %arg5[%77, %c7_i32_82] : memref<2x8x!tpu.dma_semaphore, #tpu.memory_space<semaphore_mem>> -> memref<1x1x!tpu.dma_semaphore, #tpu.memory_space<semaphore_mem>>
    %123 = tpu.memref_squeeze %122 : memref<1x1x!tpu.dma_semaphore, #tpu.memory_space<semaphore_mem>> -> memref<!tpu.dma_semaphore, #tpu.memory_space<semaphore_mem>>
    tpu.wait_dma2 semaphore(%123 : memref<!tpu.dma_semaphore, #tpu.memory_space<semaphore_mem>>) src(%120 : memref<1x32xf32, #tpu.memory_space<any>>) dst(%121 : memref<1x32xf32, #tpu.memory_space<vmem>>)
    %c1_i32_86 = arith.constant 1 : i32
    %c0 = arith.constant 0 : index
    %c0_87 = arith.constant 0 : index
    %124 = vector.load %arg4[%c0, %c0_87] : memref<8x32xf32, #tpu.memory_space<vmem>>, vector<8x32xf32>
    %cst = arith.constant 5.65685415 : f32
    %125 = vector.broadcast %cst : f32 to vector<8x32xf32>
    %126 = arith.mulf %124, %125 : vector<8x32xf32>
    %c0_88 = arith.constant 0 : index
    %c0_89 = arith.constant 0 : index
    %127 = vector.load %arg3[%c0_88, %c0_89] : memref<8x32xf32, #tpu.memory_space<vmem>>, vector<8x32xf32>
    tpu.vector_store %arg3[%c0_88, %c0_89], %126 {strides = array<i32>} : memref<8x32xf32, #tpu.memory_space<vmem>>, vector<8x32xf32>,
    return
  }
  func.func @transform_1(%arg0: i32, %arg1: memref<16xi32, #tpu.memory_space<smem>>) -> (i32, i32) {
    %c0_i32 = arith.constant 0 : i32
    %c0_i32_0 = arith.constant 0 : i32
    return %arg0, %c0_i32 : i32, i32
  }
}

</mosaic_0001>

<bundles_post_ra>
// kernel: tpu_custom_call.1
= control target key start
LH: loop header
LB: loop body
LE: loop exit
PB: predicated region body
PF: predicated region fallthrough
CT: control target
= control target key end

     0   :  { %s1033_s0 = inlined_call_operand.vmem [shape: s32[16], index: 0, kind: input, shape index: {}]   ;;  %s1034_s1 = inlined_call_operand.vmem [shape: f32[128,32], index: 1, kind: input, shape index: {}]   ;;  %s1035_s2 = inlined_call_operand.hbm [shape: f32[16,32], index: 2, kind: output, shape index: {}]  }
   0x1   :  { %s7_s11 = sshll.u32 %s1033_s0, 4  ;;  %s8_s11 = int_to_ptr.vmem [resolvable:$true] %s7_s11 }
   0x2   :  { %s800_s12 = scalar_lea.vmem %s8_s11, 16  ;;  %p805_p1 = scmp.lt.s32.totalorder %s8_s11, %s8_s11 }
   0x3   :  { %p801_p0 = scmp.ne.s32.totalorder %s8_s11, %s800_s12  ;;  %p806_p2 = scmp.lt.s32.totalorder %s800_s12, %s800_s12 }
   0x5   :  { %p807_p3 = por %p806_p2, %p805_p1 }
   0x7   :  { %p808_p4 = pnand %p807_p3, %p801_p0 }
   0x9   :  { %811 = shalt.err (!%p808_p4)  }
   0xa   :  { %s886_s13 = smov [#allocation5]  }
   0xb   :  { %10 = dma.vmem_to_smem %s8_s11, 16, %s886_s13, [#allocation4] }
   0xc   :  { %852 = dma.done.wait [#allocation4], 16 }
   0xd   :  { %853 = vsyncadd [#allocation4], 4294967280 }
   0xe   :  { %12 = sfence }
   0xf   :  { %13 = vsyncpa [#allocation7], 0 }
  0x10   :  { %15 = vsyncpa [#allocation7 + $0x1], 0  ;;  %s906_s14 = smov 0   ;;  %s908_s15 = smov 0  }
  0x11   :  { %s910_s0 = smov 0  }
  0x12 LB: > { %s743_s16 = sadd.s32 4294967295, %s884_s0   ;;  %s923_s17 = sadd.s32 1, %s884_s0   ;;  %s884_s0 = sphi %s910_s0, %s1040_s0   ;;  %s880_s15 = sphi %s908_s15, %s1039_s15   ;;  %s876_s14 = sphi %s906_s14, %s1038_s14  }
  0x13   : > { %s24_s18 = ssub.s32 %s884_s0, %s923_s17  ;;  %s27_s19 = sadd.s32 1, %s880_s15 }
  0x14   : > { %p25_p5 = scmp.eq.s32.totalorder %s24_s18, 0  ;;  %p744_p6 = scmp.ne.s32.totalorder %s24_s18, 0 }
  0x15   : > { %p31_p7 = scmp.eq.s32.totalorder %s884_s0, 1  ;;  %p36_p8 = scmp.ne.s32.totalorder %s880_s15, %s876_s14 }
  0x16   : > { %s932_s20 = scalar_select %p25_p5, %s880_s15, %s27_s19  }
  0x17   : > { %p934_p9 = por %p744_p6, %p31_p7  ;;  %p37_p10 = scmp.eq.s32.totalorder %s743_s16, 1 }
  0x18   : > { %p745_p12 = scmp.ge.s32.totalorder %s884_s0, 2 }
  0x19   : > { %p938_p11 = por %p37_p10, %p36_p8  ;;  %s51_s23 = sand.u32 (!%p745_p12), 1, %s880_s15  }
  0x1a   : > { %46 = sbr.rel (%p745_p12) target bundleno = 146 (0x92), region = 12  ;;  %s945_s24 = sshll.u32 (!%p745_p12), %s884_s0, 3 }
  0x1b   : > { %s949_s25 = sshll.u32 (!%p745_p12), %s51_s23, 3  ;;  %s56_s26 = sld [smem:[#allocation5 + %s945_s24]] (!%p745_p12) }
  0x1c   : > { %s53_s30 = scalar_lea.vmem (!%p745_p12), [#allocation6], %s949_s25 }
  0x21   : > { %s57_s29 = scalar_lea.vmem %s1034_s1, %s56_s26 }
  0x22   : > { %v75_v0 = vld [vmem:[%s57_s29] sm:$0x1] }
  0x23   : > { %76 = vst [vmem:[#allocation2] sm:$0x1] %v75_v0 }
  0x24   : > { %101 = vsyncadd [#allocation3], 16  ;;  %s103_s3 = sadd.s32 1, %s945_s24 }
  0x25   : > { %s104_s4 = sld [smem:[#allocation5 + %s103_s3]] }
  0x2b   : > { %s105_s7 = scalar_lea.vmem %s1034_s1, %s104_s4 }
  0x2c   : > { %v125_v1 = vld [vmem:[%s105_s7] sm:$0x1] }
  0x2d   : > { %126 = vst [vmem:[#allocation2 + $0x1] sm:$0x1] %v125_v1 }
  0x2e   : > { %151 = vsyncadd [#allocation3 + $0x1], 16  ;;  %s153_s8 = sadd.s32 2, %s945_s24 }
  0x2f   : > { %s154_s9 = sld [smem:[#allocation5 + %s153_s8]] }
  0x35   : > { %s155_s12 = scalar_lea.vmem %s1034_s1, %s154_s9 }
  0x36   : > { %v175_v2 = vld [vmem:[%s155_s12] sm:$0x1] }
  0x37   : > { %176 = vst [vmem:[#allocation2 + $0x2] sm:$0x1] %v175_v2 }
  0x38   : > { %201 = vsyncadd [#allocation3 + $0x2], 16  ;;  %s203_s13 = sadd.s32 3, %s945_s24 }
  0x39   : > { %s204_s16 = sld [smem:[#allocation5 + %s203_s13]] }
  0x3f   : > { %s205_s26 = scalar_lea.vmem %s1034_s1, %s204_s16 }
  0x40   : > { %v225_v3 = vld [vmem:[%s205_s26] sm:$0x1] }
  0x41   : > { %226 = vst [vmem:[#allocation2 + $0x3] sm:$0x1] %v225_v3 }
  0x42   : > { %251 = vsyncadd [#allocation3 + $0x3], 16  ;;  %s253_s27 = sadd.s32 4, %s945_s24 }
  0x43   : > { %s254_s28 = sld [smem:[#allocation5 + %s253_s27]] }
  0x49   : > { %s255_s4 = scalar_lea.vmem %s1034_s1, %s254_s28 }
  0x4a   : > { %v275_v4 = vld [vmem:[%s255_s4] sm:$0x1] }
  0x4b   : > { %276 = vst [vmem:[#allocation2 + $0x4] sm:$0x1] %v275_v4 }
  0x4c   : > { %301 = vsyncadd [#allocation3 + $0x4], 16  ;;  %s303_s5 = sadd.s32 5, %s945_s24 }
  0x4d   : > { %s304_s6 = sld [smem:[#allocation5 + %s303_s5]] }
  0x53   : > { %s305_s9 = scalar_lea.vmem %s1034_s1, %s304_s6 }
  0x54   : > { %v325_v5 = vld [vmem:[%s305_s9] sm:$0x1] }
  0x55   : > { %326 = vst [vmem:[#allocation2 + $0x5] sm:$0x1] %v325_v5 }
  0x56   : > { %351 = vsyncadd [#allocation3 + $0x5], 16  ;;  %s353_s10 = sadd.s32 6, %s945_s24 }
  0x57   : > { %s354_s11 = sld [smem:[#allocation5 + %s353_s10]] }
  0x5d   : > { %s355_s16 = scalar_lea.vmem %s1034_s1, %s354_s11 }
  0x5e   : > { %v375_v6 = vld [vmem:[%s355_s16] sm:$0x1] }
  0x5f   : > { %376 = vst [vmem:[#allocation2 + $0x6] sm:$0x1] %v375_v6 }
  0x60   : > { %401 = vsyncadd [#allocation3 + $0x6], 16  ;;  %s403_s18 = sadd.s32 7, %s945_s24 }
  0x61   : > { %s404_s19 = sld [smem:[#allocation5 + %s403_s18]] }
  0x67   : > { %s405_s28 = scalar_lea.vmem %s1034_s1, %s404_s19 }
  0x68   : > { %v425_v7 = vld [vmem:[%s405_s28] sm:$0x1] }
  0x69   : > { %426 = vst [vmem:[#allocation2 + $0x7] sm:$0x1] %v425_v7 }
  0x6a   : > { %451 = vsyncadd [#allocation3 + $0x7], 16 }
  0x6b   : > { %854 = dma.done.wait [#allocation3], 16 }
  0x6c   : > { %855 = vsyncadd [#allocation3], 4294967280 }
  0x6d   : > { %856 = dma.done.wait [#allocation3 + $0x1], 16 }
  0x6e   : > { %857 = vsyncadd [#allocation3 + $0x1], 4294967280 }
  0x6f   : > { %858 = dma.done.wait [#allocation3 + $0x2], 16 }
  0x70   : > { %859 = vsyncadd [#allocation3 + $0x2], 4294967280 }
  0x71   : > { %860 = dma.done.wait [#allocation3 + $0x3], 16 }
  0x72   : > { %861 = vsyncadd [#allocation3 + $0x3], 4294967280 }
  0x73   : > { %862 = dma.done.wait [#allocation3 + $0x4], 16 }
  0x74   : > { %863 = vsyncadd [#allocation3 + $0x4], 4294967280 }
  0x75   : > { %864 = dma.done.wait [#allocation3 + $0x5], 16 }
  0x76   : > { %865 = vsyncadd [#allocation3 + $0x5], 4294967280 }
  0x77   : > { %866 = dma.done.wait [#allocation3 + $0x6], 16 }
  0x78   : > { %867 = vsyncadd [#allocation3 + $0x6], 4294967280 }
  0x79   : > { %868 = dma.done.wait [#allocation3 + $0x7], 16 }
  0x7a   : > { %869 = vsyncadd [#allocation3 + $0x7], 4294967280  ;;  %s749_s24 = sshll.u32 %s884_s0, 7  ;;  %s487_s29 = sshll.u32 %s53_s30, 4  ;;  %v469_v8 = vld [vmem:[#allocation2] sm:$0xff]  ;;  %vm471_vm0 = vcmask 261120   ;;  %s992_s29 = int_to_ptr.vmem [resolvable:$true] %s487_s29 }
  0x7b   : > { %v470_v9 = vmul.f32 5.656854, %v469_v8  ;;  %s990_s5 = scalar_lea.hbm %s1035_s2, %s749_s24  ;;  %s474_s6 = scalar_lea.sflag [#allocation7], %s51_s23 }
  0x7c   : > { %s812_s7 = scalar_lea.vmem %s992_s29, 128  ;;  %s887_s8 = smov [#allocation6]  }
  0x7d   : > { %472 = vst.msk [vmem:[%s53_s30] sm:$0xff] %vm471_vm0, %v470_v9  ;;  %p813_p13 = scmp.ne.s32.totalorder %s992_s29, %s812_s7  ;;  %s816_s9 = sshll.u32 %s887_s8, 4  ;;  %s817_s9 = int_to_ptr.vmem [resolvable:$false] %s816_s9 }
  0x7e   : > { %s818_s10 = scalar_lea.vmem %s817_s9, 256  ;;  %p819_p2 = scmp.lt.s32.totalorder %s992_s29, %s817_s9 }
  0x7f   : > { %p814_p0 = pnand %p813_p13, %p934_p9  ;;  %p820_p3 = scmp.lt.s32.totalorder %s818_s10, %s812_s7 }
  0x81   : > { %p815_p1 = pneg %p814_p0  ;;  %p821_p4 = por %p820_p3, %p819_p2 }
  0x83   : > { %p822_p5 = pnand %p821_p4, %p815_p1 }
  0x85   : > { %825 = shalt.err (!%p822_p5)
}
  0x86   : > { %s826_s23 = scalar_lea.hbm %s990_s5, 128  ;;  %s830_s11 = scalar_lea.hbm %s1035_s2, 256 }
  0x87   : > { %p827_p6 = scmp.ne.s32.totalorder %s990_s5, %s826_s23  ;;  %p831_p10 = scmp.lt.u32.totalorder %s990_s5, %s1035_s2 }
  0x88   : > { %p832_p12 = scmp.lt.u32.totalorder %s830_s11, %s826_s23  ;;  %p834_p0 = scmp.lt.u32.totalorder %s826_s23, %s990_s5 }
  0x89   : > { %p828_p7 = pnand %p827_p6, %p934_p9 }
  0x8a   : > { %p833_p13 = por %p832_p12, %p831_p10 }
  0x8b   : > { %p829_p8 = pneg %p828_p7 }
  0x8c   : > { %p835_p1 = por %p834_p0, %p833_p13 }
  0x8e   : > { %p836_p2 = pnand %p835_p1, %p829_p8 }
  0x90   : > { %839 = shalt.err (!%p836_p2)
}
  0x91   : > { %768 = dma.vmem_to_hbm [thread:$0]  (%p934_p9), %s992_s29, 128, %s990_s5, %s474_s6  }
  0x92 PF: > { %p774_p3 = scmp.ge.s32.totalorder %s884_s0, 1  ;;  %s499_s16 = sand.u32 1, %s876_s14  }
  0x93   : > { %s500_s18 = scalar_lea.sflag [#allocation7], %s499_s16 }
  0x94   : > { %p771_p4 = pnand %p774_p3, %p938_p11 }
  0x96   : > { %871 = dma.done.wait (!%p771_p4), %s500_s18, 128  }
  0x97   : > { %873 = vsyncadd (!%p771_p4), %s500_s18, 4294967168  ;;  %p18_p5 = scmp.ge.s32.totalorder %s923_s17, 3   ;;  %s1038_s14 = smov %s880_s15 }
  0x98   : > { %s1039_s15 = smov %s932_s20  ;;  %s1040_s0 = smov %s923_s17 }
  0x99   :  { %20 = sbr.rel (!%p18_p5) target bundleno = 18 (0x12), region = 401 }
  0xa0   :  { %505 = vsyncpa [#allocation7], 1 }
  0xa1   :  { %507 = vsyncpa [#allocation7 + $0x1], 1 }
  0xa2   :  { %508 = vsyncmov [#allocation3] }
  0xa5   :  { %s509_s0 = vpop.sfrf %508 }
  0xa6   :  { %p752_p9 = scmp.ne.s32.totalorder %s509_s0, 0 }
  0xa8   :  { %513 = shalt.err (%p752_p9)  }
  0xa9   :  { %515 = vsyncmov [#allocation3 + $0x1] }
  0xac   :  { %s516_s21 = vpop.sfrf %515 }
  0xad   :  { %p753_p11 = scmp.ne.s32.totalorder %s516_s21, 0 }
  0xaf   :  { %520 = shalt.err (%p753_p11)  }
  0xb0   :  { %522 = vsyncmov [#allocation3 + $0x2] }
  0xb3   :  { %s523_s22 = vpop.sfrf %522 }
  0xb4   :  { %p754_p6 = scmp.ne.s32.totalorder %s523_s22, 0 }
  0xb6   :  { %527 = shalt.err (%p754_p6)  }
  0xb7   :  { %529 = vsyncmov [#allocation3 + $0x3] }
  0xba   :  { %s530_s19 = vpop.sfrf %529 }
  0xbb   :  { %p755_p7 = scmp.ne.s32.totalorder %s530_s19, 0 }
  0xbd   :  { %534 = shalt.err (%p755_p7)  }
  0xbe   :  { %536 = vsyncmov [#allocation3 + $0x4] }
  0xc1   :  { %s537_s17 = vpop.sfrf %536 }
  0xc2   :  { %p756_p8 = scmp.ne.s32.totalorder %s537_s17, 0 }
  0xc4   :  { %541 = shalt.err (%p756_p8)  }
  0xc5   :  { %543 = vsyncmov [#allocation3 + $0x5] }
  0xc8   :  { %s544_s1 = vpop.sfrf %543 }
  0xc9   :  { %p757_p10 = scmp.ne.s32.totalorder %s544_s1, 0 }
  0xcb   :  { %548 = shalt.err (%p757_p10)  }
  0xcc   :  { %550 = vsyncmov [#allocation3 + $0x6] }
  0xcf   :  { %s551_s2 = vpop.sfrf %550 }
  0xd0   :  { %p758_p12 = scmp.ne.s32.totalorder %s551_s2, 0 }
  0xd2   :  { %555 = shalt.err (%p758_p12)  }
  0xd3   :  { %557 = vsyncmov [#allocation3 + $0x7] }
  0xd6   :  { %s558_s14 = vpop.sfrf %557 }
  0xd7   :  { %p759_p13 = scmp.ne.s32.totalorder %s558_s14, 0 }
  0xd9   :  { %562 = shalt.err (%p759_p13)  }
  0xda   :  { %564 = vsyncmov [#allocation3 + $0x8] }
  0xdd   :  { %s565_s15 = vpop.sfrf %564 }
  0xde   :  { %p760_p0 = scmp.ne.s32.totalorder %s565_s15, 0 }
  0xe0   :  { %569 = shalt.err (%p760_p0)  }
  0xe1   :  { %571 = vsyncmov [#allocation3 + $0x9] }
  0xe4   :  { %s572_s20 = vpop.sfrf %571 }
  0xe5   :  { %p761_p1 = scmp.ne.s32.totalorder %s572_s20, 0 }
  0xe7   :  { %576 = shalt.err (%p761_p1)  }
  0xe8   :  { %578 = vsyncmov [#allocation3 + $0xa] }
  0xeb   :  { %s579_s26 = vpop.sfrf %578 }
  0xec   :  { %p762_p2 = scmp.ne.s32.totalorder %s579_s26, 0 }
  0xee   :  { %583 = shalt.err (%p762_p2)  }
  0xef   :  { %585 = vsyncmov [#allocation3 + $0xb] }
  0xf2   :  { %s586_s27 = vpop.sfrf %585 }
  0xf3   :  { %p763_p3 = scmp.ne.s32.totalorder %s586_s27, 0 }
  0xf5   :  { %590 = shalt.err (%p763_p3)  }
  0xf6   :  { %592 = vsyncmov [#allocation3 + $0xc] }
  0xf9   :  { %s593_s28 = vpop.sfrf %592 }
  0xfa   :  { %p764_p4 = scmp.ne.s32.totalorder %s593_s28, 0 }
  0xfc   :  { %597 = shalt.err (%p764_p4)  }
  0xfd   :  { %599 = vsyncmov [#allocation3 + $0xd] }
 0x100   :  { %s600_s24 = vpop.sfrf %599 }
 0x101   :  { %p765_p5 = scmp.ne.s32.totalorder %s600_s24, 0 }
 0x103   :  { %604 = shalt.err (%p765_p5)  }
 0x104   :  { %606 = vsyncmov [#allocation3 + $0xe] }
 0x107   :  { %s607_s29 = vpop.sfrf %606 }
 0x108   :  { %p766_p9 = scmp.ne.s32.totalorder %s607_s29, 0 }
 0x10a   :  { %611 = shalt.err (%p766_p9)  }
 0x10b   :  { %613 = vsyncmov [#allocation3 + $0xf] }
 0x10e   :  { %s614_s3 = vpop.sfrf %613 }
 0x10f   :  { %p767_p11 = scmp.ne.s32.totalorder %s614_s3, 0 }
 0x111   :  { %618 = shalt.err (%p767_p11)  }

</bundles_post_ra>
